<compile_context>
chip_gen: v7x
topology: tpu7x:2x2x1
jax: 0.10.0
libtpu: 0.0.40
codegen_flags: <defaults>
</compile_context>

<pallas_src>
import numpy as np

import jax
import jax.numpy as jnp
from jax.experimental import pallas as pl
from jax.experimental.pallas import tpu as pltpu


_LANE = 128
_SUBLANE = 8
_VMEM_SPEC = pl.BlockSpec(memory_space=pltpu.MemorySpace.VMEM)


def _round_up(x, m):
    return ((x + m - 1) // m) * m


# ==========================================================================
# MLP path:  Linear -> ReLU -> Linear -> ReLU -> Linear   (one fused kernel)
# ==========================================================================
def _mlp3_kernel(x_ref, w1_ref, b1_ref, w2_ref, b2_ref, w3_ref, b3_ref, o_ref):
    """bf16 MXU operands, f32 accumulation + f32 VPU (bias/ReLU)."""
    x = x_ref[...]                                                   # (Bp,128) bf16
    h = jnp.dot(x, w1_ref[...], preferred_element_type=jnp.float32) + b1_ref[...]
    h = jnp.maximum(h, 0.0).astype(jnp.bfloat16)
    h = jnp.dot(h, w2_ref[...], preferred_element_type=jnp.float32) + b2_ref[...]
    h = jnp.maximum(h, 0.0).astype(jnp.bfloat16)
    y = jnp.dot(h, w3_ref[...], preferred_element_type=jnp.float32) + b3_ref[...]
    o_ref[...] = y


def init_mlp_params(key, obs_dim, hidden_dim, latent_dim):
    ks = jax.random.split(key, 6)
    s = 0.1
    return {
        # stored as (in, out) = PyTorch weight transposed
        "w1": s * jax.random.normal(ks[0], (obs_dim, hidden_dim), jnp.float32),
        "b1": s * jax.random.normal(ks[1], (hidden_dim,), jnp.float32),
        "w2": s * jax.random.normal(ks[2], (hidden_dim, hidden_dim), jnp.float32),
        "b2": s * jax.random.normal(ks[3], (hidden_dim,), jnp.float32),
        "w3": s * jax.random.normal(ks[4], (hidden_dim, latent_dim), jnp.float32),
        "b3": s * jax.random.normal(ks[5], (latent_dim,), jnp.float32),
    }


def prepare_mlp_params(params):
    """Pad obs/hidden/latent dims to 128 (zero pad => exact math) and cast the
    matmul operands to bf16."""
    obs_dim, hidden = params["w1"].shape
    latent = params["w3"].shape[1]
    ip = _round_up(obs_dim, _LANE)
    hp = _round_up(hidden, _LANE)
    lp = _round_up(latent, _LANE)

    def pad2(a, r, c, dtype):
        return jnp.pad(a, ((0, r - a.shape[0]), (0, c - a.shape[1]))).astype(dtype)

    return {
        "w1": pad2(params["w1"], ip, hp, jnp.bfloat16),
        "b1": pad2(params["b1"].reshape(1, -1), 1, hp, jnp.float32),
        "w2": pad2(params["w2"], hp, hp, jnp.bfloat16),
        "b2": pad2(params["b2"].reshape(1, -1), 1, hp, jnp.float32),
        "w3": pad2(params["w3"], hp, lp, jnp.bfloat16),
        "b3": pad2(params["b3"].reshape(1, -1), 1, lp, jnp.float32),
        "obs_dim": obs_dim, "latent_dim": latent,
    }


def mlp_encode(obs, prep):
    """obs: (B, obs_dim) -> (B, latent_dim)."""
    B, obs_dim = obs.shape
    ip = prep["w1"].shape[0]
    lp = prep["w3"].shape[1]
    Bp = _round_up(B, _SUBLANE)
    # lane-dense (128-wide) + sublane-aligned rows; zero padding is exact.
    x = jnp.pad(obs.astype(jnp.bfloat16), ((0, Bp - B), (0, ip - obs_dim)))
    out = pl.pallas_call(
        _mlp3_kernel,
        out_shape=jax.ShapeDtypeStruct((Bp, lp), jnp.float32),
        in_specs=[_VMEM_SPEC] * 7,
        out_specs=_VMEM_SPEC,
    )(x, prep["w1"], prep["b1"], prep["w2"], prep["b2"], prep["w3"], prep["b3"])
    return out[:B, :prep["latent_dim"]]


# ==========================================================================
# CNN path: conv(3x3,s2,p1)+ReLU x3 -> global avg pool -> Linear (one kernel)
# ==========================================================================
def _conv_layer(x_bf16, s_ref, wcat_ref, b_ref, patch_ref):
    """One conv layer on a single image, expressed as
         patch[:, t*C_in:(t+1)*C_in] = S_t @ x        (stride-2 gather + zero pad)
         y = ReLU(patch @ W_cat + b)                  (single K = 9*C_in GEMM)
    x_bf16: (R_in, C_in) bf16, patch_ref: f32 VMEM scratch (R_out, 9*C_in)."""
    c_in = x_bf16.shape[-1]
    for t in range(9):                       # static unroll over the 3x3 taps
        patch_ref[:, t * c_in:(t + 1) * c_in] = jnp.dot(
            s_ref[t], x_bf16, preferred_element_type=jnp.float32)
    y = jnp.dot(patch_ref[...].astype(jnp.bfloat16), wcat_ref[...],
                preferred_element_type=jnp.float32)
    return jnp.maximum(y + b_ref[...], 0.0)            # f32 VPU bias + ReLU


def _cnn_fused_kernel(x_ref,
                      s1_ref, w1_ref, b1_ref,
                      s2_ref, w2_ref, b2_ref,
                      s3_ref, w3_ref, b3_ref,
                      fcw_ref, fcb_ref,
                      o_ref,
                      patch1_ref, patch2_ref, patch3_ref):
    """Whole conv stack for one image; all intermediates stay in VMEM/vregs."""
    x = x_ref[0]                                        # (H*W, C_in) bf16
    h1 = _conv_layer(x, s1_ref, w1_ref, b1_ref, patch1_ref)            # (H1W1,32)
    h2 = _conv_layer(h1.astype(jnp.bfloat16), s2_ref, w2_ref, b2_ref, patch2_ref)
    h3 = _conv_layer(h2.astype(jnp.bfloat16), s3_ref, w3_ref, b3_ref, patch3_ref)
    # AdaptiveAvgPool2d((1,1)) == mean over spatial rows of this image.
    pooled = jnp.sum(h3, axis=0, keepdims=True) * (1.0 / h3.shape[0])   # (1,128) f32
    y = jnp.dot(pooled.astype(jnp.bfloat16), fcw_ref[...],
                preferred_element_type=jnp.float32) + fcb_ref[...]
    o_ref[0] = y                                        # lane-dense (1, lp) store


def init_cnn_params(key, in_channels, latent_dim):
    ks = jax.random.split(key, 8)
    s = 0.1
    return {
        # conv weights kept in PyTorch layout (out, in, kh, kw)
        "conv1_w": s * jax.random.normal(ks[0], (32, in_channels, 3, 3), jnp.float32),
        "conv1_b": s * jax.random.normal(ks[1], (32,), jnp.float32),
        "conv2_w": s * jax.random.normal(ks[2], (64, 32, 3, 3), jnp.float32),
        "conv2_b": s * jax.random.normal(ks[3], (64,), jnp.float32),
        "conv3_w": s * jax.random.normal(ks[4], (128, 64, 3, 3), jnp.float32),
        "conv3_b": s * jax.random.normal(ks[5], (128,), jnp.float32),
        # final Linear stored transposed (in=128, out=latent)
        "fc_w": s * jax.random.normal(ks[6], (128, latent_dim), jnp.float32),
        "fc_b": s * jax.random.normal(ks[7], (latent_dim,), jnp.float32),
    }


def _conv_out(n):   # k=3, stride=2, pad=1  ->  floor((n + 2 - 3)/2) + 1
    return (n + 1) // 2


def _selection_matrices(H, W):
    """Per-image S[t] (0/1): maps flattened (h,w) input rows to tap t=(kh,kw) of
    each flattened (ho,wo) output row for a stride-2, pad-1, 3x3 conv.
    Out-of-bounds taps are all-zero rows (== zero padding)."""
    Ho, Wo = _conv_out(H), _conv_out(W)
    S = np.zeros((9, Ho * Wo, H * W), np.float32)
    for t in range(9):
        kh, kw = divmod(t, 3)
        for ho in range(Ho):
            h = 2 * ho + kh - 1
            if not (0 <= h < H):
                continue
            for wo in range(Wo):
                w = 2 * wo + kw - 1
                if 0 <= w < W:
                    S[t, ho * Wo + wo, h * W + w] = 1.0
    return S, Ho, Wo


def _conv_taps_cat(w_oihw):
    """(O, C_in, 3, 3) -> (9*C_in, O) bf16, row index = t*C_in + c, t = kh*3+kw.
    Matches the im2col patch layout built in-kernel."""
    O, C = w_oihw.shape[0], w_oihw.shape[1]
    return jnp.transpose(w_oihw, (2, 3, 1, 0)).reshape(9 * C, O).astype(jnp.bfloat16)


def prepare_cnn_params(params, in_channels, H, W):
    """One-time packing (batch-independent): per-image selection matrices,
    concatenated tap weights (bf16 MXU operands), f32 biases, padded fc."""
    latent = params["fc_w"].shape[1]
    lp = _round_up(latent, _LANE)

    S1, H1, W1 = _selection_matrices(H, W)
    S2, H2, W2 = _selection_matrices(H1, W1)
    S3, H3, W3 = _selection_matrices(H2, W2)

    prep = {
        "s1": jnp.asarray(S1, jnp.bfloat16), "w1": _conv_taps_cat(params["conv1_w"]),
        "b1": params["conv1_b"].reshape(1, -1).astype(jnp.float32),
        "s2": jnp.asarray(S2, jnp.bfloat16), "w2": _conv_taps_cat(params["conv2_w"]),
        "b2": params["conv2_b"].reshape(1, -1).astype(jnp.float32),
        "s3": jnp.asarray(S3, jnp.bfloat16), "w3": _conv_taps_cat(params["conv3_w"]),
        "b3": params["conv3_b"].reshape(1, -1).astype(jnp.float32),
        "fc_w": jnp.pad(params["fc_w"], ((0, 0), (0, lp - latent))).astype(jnp.bfloat16),
        "fc_b": jnp.pad(params["fc_b"].reshape(1, -1),
                        ((0, 0), (0, lp - latent))).astype(jnp.float32),
        "in_channels": in_channels, "H": H, "W": W, "latent_dim": latent,
    }

    # ---- VMEM guardrail (v7x has only 64 MiB per TensorCore) ----
    const_bytes = sum(int(v.size) * v.dtype.itemsize
                      for v in prep.values() if isinstance(v, jax.Array))
    scratch_bytes = 4 * (H1 * W1 * 9 * in_channels + H2 * W2 * 9 * 32 + H3 * W3 * 9 * 64)
    act_bytes = 4 * (H1 * W1 * 32 + H2 * W2 * 64 + H3 * W3 * 128 + 2 * lp)
    io_bytes = 2 * (H * W * in_channels * 2) + 2 * lp * 4     # double-buffered x + out
    total = const_bytes + scratch_bytes + act_bytes + io_bytes
    budget = 48 << 20                                          # headroom under 64 MiB
    assert total <= budget, (
        f"prepared CNN kernel needs ~{total} B of VMEM, over budget {budget} B; "
        "tile the spatial gather instead of growing H/W")
    prep["vmem_limit_bytes"] = int(min(max(4 * total, 32 << 20), 100 << 20))
    return prep


def cnn_encode(obs_rows, prep):
    """obs_rows: (B, H*W, C) channel-last rows -> (B, latent_dim).
    Use cnn_encode_nchw() for PyTorch-convention NCHW input."""
    B, hw, c = obs_rows.shape
    assert hw == prep["H"] * prep["W"] and c == prep["in_channels"]
    s1, s2, s3 = prep["s1"], prep["s2"], prep["s3"]
    w1, w2, w3 = prep["w1"], prep["w2"], prep["w3"]
    lp = prep["fc_w"].shape[1]
    x = obs_rows.astype(jnp.bfloat16)        # halve HBM->VMEM DMA bytes

    grid_spec = pltpu.PrefetchScalarGridSpec(
        num_scalar_prefetch=0,
        grid=(B,),                           # one image per grid step
        in_specs=[
            pl.BlockSpec((1, hw, c), lambda b: (b, 0, 0)),        # per-image block
            # constants: same block every step -> DMA'd once, VMEM-resident
            pl.BlockSpec(s1.shape, lambda b: (0, 0, 0)),
            pl.BlockSpec(w1.shape, lambda b: (0, 0)),
            pl.BlockSpec(prep["b1"].shape, lambda b: (0, 0)),
            pl.BlockSpec(s2.shape, lambda b: (0, 0, 0)),
            pl.BlockSpec(w2.shape, lambda b: (0, 0)),
            pl.BlockSpec(prep["b2"].shape, lambda b: (0, 0)),
            pl.BlockSpec(s3.shape, lambda b: (0, 0, 0)),
            pl.BlockSpec(w3.shape, lambda b: (0, 0)),
            pl.BlockSpec(prep["b3"].shape, lambda b: (0, 0)),
            pl.BlockSpec(prep["fc_w"].shape, lambda b: (0, 0)),
            pl.BlockSpec(prep["fc_b"].shape, lambda b: (0, 0)),
        ],
        out_specs=pl.BlockSpec((1, 1, lp), lambda b: (b, 0, 0)),
        scratch_shapes=[                      # f32 im2col patch buffers (per layer)
            pltpu.VMEM((s1.shape[1], w1.shape[0]), jnp.float32),
            pltpu.VMEM((s2.shape[1], w2.shape[0]), jnp.float32),
            pltpu.VMEM((s3.shape[1], w3.shape[0]), jnp.float32),
        ],
    )
    out = pl.pallas_call(
        _cnn_fused_kernel,
        out_shape=jax.ShapeDtypeStruct((B, 1, lp), jnp.float32),
        grid_spec=grid_spec,
        compiler_params=pltpu.CompilerParams(
            dimension_semantics=("parallel",),          # batch over v7x's 2 TCs
            vmem_limit_bytes=prep["vmem_limit_bytes"]),
    )(x, s1, w1, prep["b1"], s2, w2, prep["b2"], s3, w3, prep["b3"],
      prep["fc_w"], prep["fc_b"])
    return out[:, 0, :prep["latent_dim"]]


def cnn_encode_nchw(obs_nchw, prep):
    """PyTorch-convention (B, C, H, W) wrapper (one tiny layout transpose)."""
    B, C, H, W = obs_nchw.shape
    rows = jnp.transpose(obs_nchw, (0, 2, 3, 1)).reshape(B, H * W, C)
    return cnn_encode(rows, prep)


# ==========================================================================
# Pure-JAX references (correctness check)
# ==========================================================================
def _mlp_reference(obs, params):
    h = jnp.maximum(obs @ params["w1"] + params["b1"], 0.0)
    h = jnp.maximum(h @ params["w2"] + params["b2"], 0.0)
    return h @ params["w3"] + params["b3"]


def _cnn_reference(obs, params):
    x = obs
    for i in (1, 2, 3):
        w = params[f"conv{i}_w"]
        b = params[f"conv{i}_b"]
        x = jax.lax.conv_general_dilated(
            x, w, window_strides=(2, 2), padding=((1, 1), (1, 1)),
            dimension_numbers=("NCHW", "OIHW", "NCHW"),
            precision=jax.lax.Precision.HIGHEST)
        x = jnp.maximum(x + b[None, :, None, None], 0.0)
    pooled = jnp.mean(x, axis=(2, 3))
    return pooled @ params["fc_w"] + params["fc_b"]


# ==========================================================================
if __name__ == "__main__":
    key = jax.random.PRNGKey(0)
    k_pm, k_pc, k_om, k_oc = jax.random.split(key, 4)

    # ---- MLP encoder: obs_dim=16, hidden_dim=32, latent_dim=8, batch=2 ----
    obs_dim, hidden_dim, latent_dim = 16, 32, 8
    mlp_params = init_mlp_params(k_pm, obs_dim, hidden_dim, latent_dim)
    mlp_prep = prepare_mlp_params(mlp_params)
    obs_mlp = jax.random.normal(k_om, (2, obs_dim), jnp.float32)
    z_mlp = mlp_encode(obs_mlp, mlp_prep)
    jax.block_until_ready(z_mlp)
    assert z_mlp.shape == (2, latent_dim)
    with jax.default_matmul_precision("highest"):
        z_mlp_ref = _mlp_reference(obs_mlp, mlp_params)
    mlp_err = float(jnp.max(jnp.abs(z_mlp - z_mlp_ref)))
    assert jnp.allclose(z_mlp, z_mlp_ref, atol=3e-2, rtol=3e-2), mlp_err

    # ---- CNN encoder: batch=2, channels=4, 16x16, latent_dim=8 ----
    B, channels, H, W = 2, 4, 16, 16
    cnn_params = init_cnn_params(k_pc, channels, latent_dim)
    cnn_prep = prepare_cnn_params(cnn_params, channels, H, W)
    obs_cnn = jax.random.normal(k_oc, (B, channels, H, W), jnp.float32)
    z_cnn = cnn_encode_nchw(obs_cnn, cnn_prep)
    jax.block_until_ready(z_cnn)
    assert z_cnn.shape == (B, latent_dim)
    with jax.default_matmul_precision("highest"):
        z_cnn_ref = _cnn_reference(obs_cnn, cnn_params)
    cnn_err = float(jnp.max(jnp.abs(z_cnn - z_cnn_ref)))
    assert jnp.allclose(z_cnn, z_cnn_ref, atol=3e-2, rtol=3e-2), cnn_err

    print("KERNEL_OK")
</pallas_src>

<mosaic_0001>
module attributes {stable_mosaic.version = 11 : i64} {
  func.func @_mlp3_kernel(%arg0: memref<8x128xbf16, #tpu.memory_space<vmem>>, %arg1: memref<128x128xbf16, #tpu.memory_space<vmem>>, %arg2: memref<1x128xf32, #tpu.memory_space<vmem>>, %arg3: memref<128x128xbf16, #tpu.memory_space<vmem>>, %arg4: memref<1x128xf32, #tpu.memory_space<vmem>>, %arg5: memref<128x128xbf16, #tpu.memory_space<vmem>>, %arg6: memref<1x128xf32, #tpu.memory_space<vmem>>, %arg7: memref<8x128xf32, #tpu.memory_space<vmem>>) attributes {dimension_semantics = [], scalar_prefetch = 0 : i64, scratch_operands = 0 : i64, tpu.core_type = #tpu.core_type<tc>} {
    %c0 = arith.constant 0 : index
    %c0_0 = arith.constant 0 : index
    %0 = vector.load %arg0[%c0, %c0_0] : memref<8x128xbf16, #tpu.memory_space<vmem>>, vector<8x128xbf16>
    %c0_1 = arith.constant 0 : index
    %c0_2 = arith.constant 0 : index
    %1 = vector.load %arg1[%c0_1, %c0_2] : memref<128x128xbf16, #tpu.memory_space<vmem>>, vector<128x128xbf16>
    %cst = arith.constant dense<0.000000e+00> : vector<8x128xf32>
    %2 = tpu.matmul %0, %1, %cst {dimension_numbers = #tpu.dot_dimension_numbers<[1], [0], [0], [1], [0, 0, 1, 1], [], []>} : vector<8x128xbf16>, vector<128x128xbf16>, vector<8x128xf32> -> vector<8x128xf32>
    %c0_3 = arith.constant 0 : index
    %c0_4 = arith.constant 0 : index
    %3 = vector.load %arg2[%c0_3, %c0_4] : memref<1x128xf32, #tpu.memory_space<vmem>>, vector<1x128xf32>
    %4 = vector.broadcast %3 : vector<1x128xf32> to vector<8x128xf32>
    %5 = arith.addf %2, %4 : vector<8x128xf32>
    %cst_5 = arith.constant 0.000000e+00 : f32
    %6 = vector.broadcast %cst_5 : f32 to vector<8x128xf32>
    %7 = arith.maximumf %5, %6 : vector<8x128xf32>
    %8 = arith.truncf %7 : vector<8x128xf32> to vector<8x128xbf16>
    %c0_6 = arith.constant 0 : index
    %c0_7 = arith.constant 0 : index
    %9 = vector.load %arg3[%c0_6, %c0_7] : memref<128x128xbf16, #tpu.memory_space<vmem>>, vector<128x128xbf16>
    %cst_8 = arith.constant dense<0.000000e+00> : vector<8x128xf32>
    %10 = tpu.matmul %8, %9, %cst_8 {dimension_numbers = #tpu.dot_dimension_numbers<[1], [0], [0], [1], [0, 0, 1, 1], [], []>} : vector<8x128xbf16>, vector<128x128xbf16>, vector<8x128xf32> -> vector<8x128xf32>
    %c0_9 = arith.constant 0 : index
    %c0_10 = arith.constant 0 : index
    %11 = vector.load %arg4[%c0_9, %c0_10] : memref<1x128xf32, #tpu.memory_space<vmem>>, vector<1x128xf32>
    %12 = vector.broadcast %11 : vector<1x128xf32> to vector<8x128xf32>
    %13 = arith.addf %10, %12 : vector<8x128xf32>
    %cst_11 = arith.constant 0.000000e+00 : f32
    %14 = vector.broadcast %cst_11 : f32 to vector<8x128xf32>
    %15 = arith.maximumf %13, %14 : vector<8x128xf32>
    %16 = arith.truncf %15 : vector<8x128xf32> to vector<8x128xbf16>
    %c0_12 = arith.constant 0 : index
    %c0_13 = arith.constant 0 : index
    %17 = vector.load %arg5[%c0_12, %c0_13] : memref<128x128xbf16, #tpu.memory_space<vmem>>, vector<128x128xbf16>
    %cst_14 = arith.constant dense<0.000000e+00> : vector<8x128xf32>
    %18 = tpu.matmul %16, %17, %cst_14 {dimension_numbers = #tpu.dot_dimension_numbers<[1], [0], [0], [1], [0, 0, 1, 1], [], []>} : vector<8x128xbf16>, vector<128x128xbf16>, vector<8x128xf32> -> vector<8x128xf32>
    %c0_15 = arith.constant 0 : index
    %c0_16 = arith.constant 0 : index
    %19 = vector.load %arg6[%c0_15, %c0_16] : memref<1x128xf32, #tpu.memory_space<vmem>>, vector<1x128xf32>
    %20 = vector.broadcast %19 : vector<1x128xf32> to vector<8x128xf32>
    %21 = arith.addf %18, %20 : vector<8x128xf32>
    %c0_17 = arith.constant 0 : index
    %c0_18 = arith.constant 0 : index
    %22 = vector.load %arg7[%c0_17, %c0_18] : memref<8x128xf32, #tpu.memory_space<vmem>>, vector<8x128xf32>
    tpu.vector_store %arg7[%c0_17, %c0_18], %21 {strides = array<i32>} : memref<8x128xf32, #tpu.memory_space<vmem>>, vector<8x128xf32>,
    return
  }
}

</mosaic_0001>

<bundles_post_ra>
// kernel: tpu_custom_call.1
= control target key start
LH: loop header
LB: loop body
LE: loop exit
PB: predicated region body
PF: predicated region fallthrough
CT: control target
= control target key end

     0   :  { %12 = vsyncpa [#allocation3], 0  ;;  %s859_s0 = inlined_call_operand.hbm [shape: bf16[8,128], index: 0, kind: input, shape index: {}]   ;;  %s860_s1 = inlined_call_operand.hbm [shape: bf16[128,128], index: 1, kind: input, shape index: {}]   ;;  %s861_s2 = inlined_call_operand.vmem [shape: f32[1,128], index: 2, kind: input, shape index: {}]   ;;  %s862_s3 = inlined_call_operand.hbm [shape: bf16[128,128], index: 3, kind: input, shape index: {}]   ;;  %s863_s4 = inlined_call_operand.vmem [shape: f32[1,128], index: 4, kind: input, shape index: {}]   ;;  %s864_s5 = inlined_call_operand.hbm [shape: bf16[128,128], index: 5, kind: input, shape index: {}]   ;;  %s865_s6 = inlined_call_operand.vmem [shape: f32[1,128], index: 6, kind: input, shape index: {}]   ;;  %s866_s7 = inlined_call_operand.hbm [shape: f32[8,128], index: 7, kind: output, shape index: {}]  }
   0x1   :  { %13 = vsyncpa [#allocation6], 0 }
   0x2   :  { %14 = vsyncpa [#allocation9], 0 }
   0x3   :  { %15 = vsyncpa [#allocation4], 0  ;;  %s702_s24 = smov [#allocation5]   ;;  %s584_s28 = scalar_lea.hbm %s860_s1, 1024 }
   0x4   :  { %s31_s25 = sshll.u32 %s702_s24, 4  ;;  %p585_p0 = scmp.ne.s32.totalorder %s860_s1, %s584_s28  ;;  %s32_s25 = int_to_ptr.vmem [resolvable:$true] %s31_s25 }
   0x5   :  { %p588_p1 = scmp.lt.u32.totalorder %s584_s28, %s860_s1 }
   0x7   :  { %p590_p2 = pnand %p588_p1, %p585_p0 }
   0x9   :  { %593 = shalt.err (!%p590_p2)
}
   0xa   :  { %s594_s10 = scalar_lea.vmem %s32_s25, 1024  ;;  %p599_p4 = scmp.lt.s32.totalorder %s32_s25, %s32_s25 }
   0xb   :  { %p595_p3 = scmp.ne.s32.totalorder %s32_s25, %s594_s10  ;;  %p600_p5 = scmp.lt.s32.totalorder %s594_s10, %s594_s10 }
   0xd   :  { %p601_p6 = por %p600_p5, %p599_p4 }
   0xf   :  { %p602_p7 = pnand %p601_p6, %p595_p3 }
  0x11   :  { %605 = shalt.err (!%p602_p7)
}
  0x12   :  { %s703_s11 = smov 64   ;;  %s704_s12 = smov 4  }
  0x13   :  { %37 = dma.hbm_to_vmem [thread:$0]  %s860_s1, 1024, %s32_s25, [#allocation6], %s703_s11, %s703_s11, %s704_s12  }
  0x14   :  { %s705_s15 = smov [#allocation2]   ;;  %s706_s17 = smov [#allocation7]  }
  0x15   :  { %s22_s16 = sshll.u32 %s705_s15, 4  ;;  %s45_s18 = sshll.u32 %s706_s17, 4  ;;  %s23_s16 = int_to_ptr.vmem [resolvable:$true] %s22_s16  ;;  %s46_s18 = int_to_ptr.vmem [resolvable:$true] %s45_s18 }
  0x16   :  { %s606_s21 = scalar_lea.hbm %s859_s0, 64 }
  0x17   :  { %p607_p8 = scmp.ne.s32.totalorder %s859_s0, %s606_s21  ;;  %p610_p9 = scmp.lt.u32.totalorder %s606_s21, %s859_s0 }
  0x19   :  { %p612_p10 = pnand %p610_p9, %p607_p8 }
  0x1b   :  { %615 = shalt.err (!%p612_p10)
}
  0x1c   :  { %s616_s1 = scalar_lea.vmem %s23_s16, 64  ;;  %p621_p12 = scmp.lt.s32.totalorder %s23_s16, %s23_s16 }
  0x1d   :  { %p617_p11 = scmp.ne.s32.totalorder %s23_s16, %s616_s1  ;;  %p622_p13 = scmp.lt.s32.totalorder %s616_s1, %s616_s1 }
  0x1f   :  { %p623_p0 = por %p622_p13, %p621_p12 }
  0x21   :  { %p624_p1 = pnand %p623_p0, %p617_p11 }
  0x23   :  { %627 = shalt.err (!%p624_p1)
}
  0x24   :  { %25 = dma.hbm_to_vmem [thread:$0]  %s859_s0, 64, %s23_s16, [#allocation3]  }
  0x25   :  { %s628_s30 = scalar_lea.hbm %s862_s3, 1024 }
  0x26   :  { %p629_p2 = scmp.ne.s32.totalorder %s862_s3, %s628_s30  ;;  %p632_p3 = scmp.lt.u32.totalorder %s628_s30, %s862_s3 }
  0x28   :  { %p634_p4 = pnand %p632_p3, %p629_p2 }
  0x2a   :  { %637 = shalt.err (!%p634_p4)
}
  0x2b   :  { %s638_s14 = scalar_lea.vmem %s46_s18, 1024  ;;  %p643_p6 = scmp.lt.s32.totalorder %s46_s18, %s46_s18 }
  0x2c   :  { %p639_p5 = scmp.ne.s32.totalorder %s46_s18, %s638_s14  ;;  %p644_p7 = scmp.lt.s32.totalorder %s638_s14, %s638_s14 }
  0x2e   :  { %p645_p8 = por %p644_p7, %p643_p6 }
  0x30   :  { %p646_p9 = pnand %p645_p8, %p639_p5 }
  0x32   :  { %649 = shalt.err (!%p646_p9)
}
  0x33   :  { %51 = dma.hbm_to_vmem [thread:$0]  %s862_s3, 1024, %s46_s18, [#allocation6], %s703_s11, %s703_s11, %s704_s12  }
  0x34   :  { %s707_s16 = smov [#allocation8]   ;;  %s650_s21 = scalar_lea.hbm %s864_s5, 1024 }
  0x35   :  { %s59_s17 = sshll.u32 %s707_s16, 4  ;;  %p651_p10 = scmp.ne.s32.totalorder %s864_s5, %s650_s21  ;;  %s60_s17 = int_to_ptr.vmem [resolvable:$true] %s59_s17 }
  0x36   :  { %p654_p11 = scmp.lt.u32.totalorder %s650_s21, %s864_s5 }
  0x38   :  { %p656_p12 = pnand %p654_p11, %p651_p10 }
  0x3a   :  { %659 = shalt.err (!%p656_p12)
}
  0x3b   :  { %s660_s1 = scalar_lea.vmem %s60_s17, 1024  ;;  %p665_p0 = scmp.lt.s32.totalorder %s60_s17, %s60_s17 }
  0x3c   :  { %p661_p13 = scmp.ne.s32.totalorder %s60_s17, %s660_s1  ;;  %p666_p1 = scmp.lt.s32.totalorder %s660_s1, %s660_s1 }
  0x3e   :  { %p667_p2 = por %p666_p1, %p665_p0 }
  0x40   :  { %p668_p3 = pnand %p667_p2, %p661_p13 }
  0x42   :  { %671 = shalt.err (!%p668_p3)
}
  0x43   :  { %65 = dma.hbm_to_vmem [thread:$0]  %s864_s5, 1024, %s60_s17, [#allocation9], %s703_s11, %s703_s11, %s704_s12  }
  0x44   :  { %694 = dma.done.wait [#allocation3], 64  }
  0x45   :  { %695 = vsyncadd [#allocation3], 4294967232 }
  0x46   :  { %696 = dma.done.wait [#allocation6], 2048  }
  0x47   :  { %697 = vsyncadd [#allocation6], 4294965248 }
  0x48   :  { %698 = dma.done.wait [#allocation9], 1024  }
  0x49   :  { %699 = vsyncadd [#allocation9], 4294966272  ;;  %v708_v0 = vmov 0.0   ;;  %vm709_vm0 = vmmov 0   ;;  %v560_v1 = vld [vmem:[#allocation5] sm:$0xff]   ;;  %v561_v2 = vld [vmem:[#allocation5 + $0x8] sm:$0xff]  }
  0x4a   :  { %491 = vmatprep.subr.bf16.mxu0 %v708_v0  ;;  %507 = vmatprep.mubr.msk.bf16.mxu0 %vm709_vm0, %v708_v0  ;;  %v562_v3 = vld [vmem:[#allocation5 + $0x10] sm:$0xff]   ;;  %v568_v4 = vld [vmem:[#allocation7] sm:$0xff]   ;;  %v563_v5 = vld [vmem:[#allocation5 + $0x18] sm:$0xff]   ;;  %s710_s28 = smov [#allocation10]  }
  0x4b   :  { %511 = vmatprep.subr.bf16.mxu1 %v708_v0  ;;  %527 = vmatprep.mubr.msk.bf16.mxu1 %vm709_vm0, %v708_v0  ;;  %v569_v6 = vld [vmem:[#allocation7 + $0x8] sm:$0xff]   ;;  %v564_v7 = vld [vmem:[#allocation5 + $0x20] sm:$0xff]   ;;  %v570_v8 = vld [vmem:[#allocation7 + $0x10] sm:$0xff]   ;;  %s426_s29 = sshll.u32 %s710_s28, 4  ;;  %s427_s29 = int_to_ptr.vmem [resolvable:$true] %s426_s29 }
  0x4c   :  { %492 = vmatpush3.bf16.msra.mxu0 %v560_v1  ;;  %512 = vmatpush3.bf16.msra.mxu1 %v568_v4  ;;  %v565_v9 = vld [vmem:[#allocation5 + $0x28] sm:$0xff]   ;;  %v571_v10 = vld [vmem:[#allocation7 + $0x18] sm:$0xff]   ;;  %v566_v11 = vld [vmem:[#allocation5 + $0x30] sm:$0xff]   ;;  %p677_p5 = scmp.lt.s32.totalorder %s427_s29, %s427_s29 }
  0x4d   :  { %493 = vmatprep.subr.bf16.mxu0 %v708_v0  ;;  %513 = vmatprep.subr.bf16.mxu1 %v708_v0  ;;  %v572_v12 = vld [vmem:[#allocation7 + $0x20] sm:$0xff]   ;;  %v567_v13 = vld [vmem:[#allocation5 + $0x38] sm:$0xff]   ;;  %v573_v14 = vld [vmem:[#allocation7 + $0x28] sm:$0xff]  }
  0x4e   :  { %v81_v15 = vld [vmem:[#allocation2] sm:$0xf]  ;;  %v574_v16 = vld [vmem:[#allocation7 + $0x30] sm:$0xff]   ;;  %v576_v18 = vld [vmem:[#allocation8] sm:$0xff]  }
  0x4f   :  { %v575_v17 = vld [vmem:[#allocation7 + $0x38] sm:$0xff]   ;;  %v577_v19 = vld [vmem:[#allocation8 + $0x8] sm:$0xff]   ;;  %v578_v20 = vld [vmem:[#allocation8 + $0x10] sm:$0xff]  }
  0x50   :  { %494 = vmatpush3.bf16.msra.mxu0 %v561_v2  ;;  %514 = vmatpush3.bf16.msra.mxu1 %v569_v6  ;;  %v579_v21 = vld [vmem:[#allocation8 + $0x18] sm:$0xff]   ;;  %v580_v22 = vld [vmem:[#allocation8 + $0x20] sm:$0xff]   ;;  %v581_v23 = vld [vmem:[#allocation8 + $0x28] sm:$0xff]  }
  0x51   :  { %495 = vmatprep.subr.bf16.mxu0 %v708_v0  ;;  %515 = vmatprep.subr.bf16.mxu1 %v708_v0  ;;  %v437_v24 = vld [vmem:[%s861_s2] ss:$0 sm:$0xff]  ;;  %v582_v32 = vld [vmem:[#allocation8 + $0x30] sm:$0xff]  }
  0x52   :  { %v583_v33 = vld [vmem:[#allocation8 + $0x38] sm:$0xff]  }
  0x53   :  { %v446_v34 = vld [vmem:[%s863_s4] ss:$0 sm:$0xff]  ;;  %s672_s4 = scalar_lea.vmem %s427_s29, 128 }
  0x54   :  { %496 = vmatpush3.bf16.msra.mxu0 %v562_v3  ;;  %516 = vmatpush3.bf16.msra.mxu1 %v570_v8  ;;  %v455_v42 = vld [vmem:[%s865_s6] ss:$0 sm:$0xff]  ;;  %p673_p4 = scmp.ne.s32.totalorder %s427_s29, %s672_s4  ;;  %p678_p6 = scmp.lt.s32.totalorder %s672_s4, %s672_s4 }
  0x55   :  { %497 = vmatprep.subr.bf16.mxu0 %v708_v0  ;;  %517 = vmatprep.subr.bf16.mxu1 %v708_v0 }
  0x56   :  { %p679_p7 = por %p678_p6, %p677_p5 }
  0x58   :  { %498 = vmatpush3.bf16.msra.mxu0 %v563_v5  ;;  %518 = vmatpush3.bf16.msra.mxu1 %v571_v10  ;;  %p680_p8 = pnand %p679_p7, %p673_p4 }
  0x59   :  { %499 = vmatprep.subr.bf16.mxu0 %v708_v0  ;;  %519 = vmatprep.subr.bf16.mxu1 %v708_v0 }
  0x5c   :  { %500 = vmatpush3.bf16.msra.mxu0 %v564_v7  ;;  %520 = vmatpush3.bf16.msra.mxu1 %v572_v12 }
  0x5d   :  { %501 = vmatprep.subr.bf16.mxu0 %v708_v0  ;;  %521 = vmatprep.subr.bf16.mxu1 %v708_v0 }
  0x60   :  { %502 = vmatpush3.bf16.msra.mxu0 %v565_v9  ;;  %522 = vmatpush3.bf16.msra.mxu1 %v573_v14 }
  0x61   :  { %503 = vmatprep.subr.bf16.mxu0 %v708_v0  ;;  %523 = vmatprep.subr.bf16.mxu1 %v708_v0 }
  0x64   :  { %504 = vmatpush3.bf16.msra.mxu0 %v566_v11  ;;  %524 = vmatpush3.bf16.msra.mxu1 %v574_v16 }
  0x65   :  { %505 = vmatprep.subr.bf16.mxu0 %v708_v0  ;;  %525 = vmatprep.subr.bf16.mxu1 %v708_v0 }
  0x68   :  { %506 = vmatpush3.bf16.msra.mxu0 %v567_v13  ;;  %526 = vmatpush3.bf16.msra.mxu1 %v575_v17 }
  0x69   :  { %531 = vmatprep.subr.bf16.mxu0 %v708_v0 }
  0x6b   :  { %508 = vmatmul.mubr.bf16.vlgmr.msra.gmra.mrb[0].mxu0 %v81_v15 }
  0x6c   :  { %547 = vmatprep.mubr.msk.bf16.mxu0 %vm709_vm0, %v708_v0  ;;  %532 = vmatpush3.bf16.msra.mxu0 %v576_v18 }
  0x6d   :  { %533 = vmatprep.subr.bf16.mxu0 %v708_v0 }
  0x70   :  { %534 = vmatpush3.bf16.msra.mxu0 %v577_v19 }
  0x71   :  { %535 = vmatprep.subr.bf16.mxu0 %v708_v0 }
  0x74   :  { %536 = vmatpush3.bf16.msra.mxu0 %v578_v20 }
  0x75   :  { %537 = vmatprep.subr.bf16.mxu0 %v708_v0 }
  0x78   :  { %538 = vmatpush3.bf16.msra.mxu0 %v579_v21 }
  0x79   :  { %539 = vmatprep.subr.bf16.mxu0 %v708_v0 }
  0x7c   :  { %540 = vmatpush3.bf16.msra.mxu0 %v580_v22 }
  0x7d   :  { %541 = vmatprep.subr.bf16.mxu0 %v708_v0 }
  0x80   :  { %542 = vmatpush3.bf16.msra.mxu0 %v581_v23 }
  0x81   :  { %543 = vmatprep.subr.bf16.mxu0 %v708_v0 }
  0x84   :  { %544 = vmatpush3.bf16.msra.mxu0 %v582_v32 }
  0x85   :  { %545 = vmatprep.subr.bf16.mxu0 %v708_v0 }
  0x88   :  { %546 = vmatpush3.bf16.msra.mxu0 %v583_v33 }
 0x13e   :  { %v187_v25 = vpop.f32.mrb[0].mxu0 }
 0x13f   :  { %v188_v26 = vadd.f32 %v437_v24, %v187_v25  ;;  %v509_v27 = vpop.f32.mrb[1].mxu0 }
 0x140   :  { %v190_v28 = vpop.f32.mrb[2].mxu0 }
 0x141   :  { %v193_v29 = vmax.f32 %v188_v26, 0.0  ;;  %v510_v30 = vpop.f32.mrb[3].mxu0 }
 0x143   :  { %v194_v31 = vpack.c.bf16 %v193_v29, %v193_v29 }
 0x145   :  { %528 = vmatmul.mubr.bf16.vlgmr.msra.gmra.mrb[0].mxu1 %v194_v31 }
 0x218   :  { %v300_v35 = vpop.f32.mrb[0].mxu1 }
 0x219   :  { %v301_v36 = vadd.f32 %v446_v34, %v300_v35  ;;  %v529_v37 = vpop.f32.mrb[1].mxu1 }
 0x21a   :  { %v303_v38 = vpop.f32.mrb[2].mxu1 }
 0x21b   :  { %v306_v39 = vmax.f32 %v301_v36, 0.0  ;;  %v530_v40 = vpop.f32.mrb[3].mxu1 }
 0x21d   :  { %v307_v41 = vpack.c.bf16 %v306_v39, %v306_v39 }
 0x21f   :  { %548 = vmatmul.mubr.bf16.vlgmr.msra.gmra.mrb[4].mxu0 %v307_v41 }
 0x2f2   :  { %v413_v43 = vpop.f32.mrb[4].mxu0 }
 0x2f3   :  { %v414_v44 = vadd.f32 %v455_v42, %v413_v43  ;;  %v549_v45 = vpop.f32.mrb[5].mxu0 }
 0x2f4   :  { %v416_v46 = vpop.f32.mrb[6].mxu0 }
 0x2f5   :  { %419 = vst [vmem:[#allocation10] sm:$0xff] %v414_v44  ;;  %v550_v47 = vpop.f32.mrb[7].mxu0 }
 0x2f6   :  { %683 = shalt.err (!%p680_p8)
}
 0x2f7   :  { %s684_s6 = scalar_lea.hbm %s866_s7, 128 }
 0x2f8   :  { %p685_p9 = scmp.ne.s32.totalorder %s866_s7, %s684_s6  ;;  %p688_p10 = scmp.lt.u32.totalorder %s684_s6, %s866_s7 }
 0x2fa   :  { %p690_p11 = pnand %p688_p10, %p685_p9 }
 0x2fc   :  { %693 = shalt.err (!%p690_p11)
}
 0x2fd   :  { %429 = dma.vmem_to_hbm [thread:$0]  %s427_s29, 128, %s866_s7, [#allocation4]  }
 0x2fe   :  { %700 = dma.done.wait [#allocation4], 128  }
 0x2ff   :  { %701 = vsyncadd [#allocation4], 4294967168 }
 0x300   :  { %433 = vsyncpa [#allocation3], 1 }
 0x301   :  { %434 = vsyncpa [#allocation6], 1 }
 0x302   :  { %435 = vsyncpa [#allocation9], 1 }
 0x303   :  { %436 = vsyncpa [#allocation4], 1 }

</bundles_post_ra>
